<compile_context>
chip_gen: v5e
topology: v5e:2x2
jax: 0.10.0
libtpu: 0.0.40
codegen_flags: <defaults>
</compile_context>

<pallas_src>
import functools
import math

import jax
import jax.numpy as jnp
from jax.experimental import pallas as pl
from jax.experimental.pallas import tpu as pltpu


# ----------------------------------------------------------------------------
# Helpers
# ----------------------------------------------------------------------------
def _pick_tile(dim, cap, align):
    """Largest tile <= cap that divides `dim` and is a multiple of `align`,
    else the full dim (full-extent blocks are always legal)."""
    if dim <= cap:
        return dim
    t = (cap // align) * align
    while t >= align:
        if dim % t == 0:
            return t
        t -= align
    return dim


class KeyGen:
    def __init__(self, seed):
        self.key = jax.random.PRNGKey(seed)

    def __call__(self):
        self.key, k = jax.random.split(self.key)
        return k


# ----------------------------------------------------------------------------
# Tiled matmul (+ optional fused BN+ReLU prologue, + bias epilogue)
# ----------------------------------------------------------------------------
def _mm_kernel(a_ref, b_ref, s_ref, t_ref, bias_ref, o_ref, acc_ref,
               *, pre_relu, k_steps):
    @pl.when(pl.program_id(2) == 0)
    def _init():
        acc_ref[...] = jnp.zeros_like(acc_ref)

    a = a_ref[...] * s_ref[...] + t_ref[...]          # fused BN (identity if s=1,t=0)
    if pre_relu:
        a = jnp.maximum(a, 0.0)
    acc_ref[...] += jnp.dot(a.astype(jnp.bfloat16),
                            b_ref[...].astype(jnp.bfloat16),
                            preferred_element_type=jnp.float32)

    @pl.when(pl.program_id(2) == k_steps - 1)
    def _flush():
        o_ref[...] = acc_ref[...] + bias_ref[...]


def pallas_matmul(a, b, bias=None, pre_scale=None, pre_shift=None):
    """(M,K)@(K,N) [+bias] with optional fused per-K-channel scale/shift + ReLU
    on A (used to fuse BatchNorm+ReLU into the following 1x1 conv)."""
    M, K = a.shape
    K2, N = b.shape
    assert K == K2
    pre = pre_scale is not None
    if not pre:
        pre_scale = jnp.ones((1, K), jnp.float32)
        pre_shift = jnp.zeros((1, K), jnp.float32)
    if bias is None:
        bias = jnp.zeros((N,), jnp.float32)
    bias2 = bias.reshape(1, N)

    tm = _pick_tile(M, 256, 8)
    tk = _pick_tile(K, 512, 128)
    tn = _pick_tile(N, 256, 128)
    grid = (M // tm, N // tn, K // tk)
    kernel = functools.partial(_mm_kernel, pre_relu=pre, k_steps=grid[2])
    return pl.pallas_call(
        kernel,
        grid=grid,
        in_specs=[
            pl.BlockSpec((tm, tk), lambda i, j, k: (i, k)),
            pl.BlockSpec((tk, tn), lambda i, j, k: (k, j)),
            pl.BlockSpec((1, tk), lambda i, j, k: (0, k)),
            pl.BlockSpec((1, tk), lambda i, j, k: (0, k)),
            pl.BlockSpec((1, tn), lambda i, j, k: (0, j)),
        ],
        out_specs=pl.BlockSpec((tm, tn), lambda i, j, k: (i, j)),
        out_shape=jax.ShapeDtypeStruct((M, N), jnp.float32),
        scratch_shapes=[pltpu.VMEM((tm, tn), jnp.float32)],
        compiler_params=pltpu.CompilerParams(
            dimension_semantics=("parallel", "parallel", "arbitrary")),
    )(a, b, pre_scale, pre_shift, bias2)


# ----------------------------------------------------------------------------
# BatchNorm statistics -> per-channel (scale, shift), and standalone apply
# ----------------------------------------------------------------------------
def _bn_stats_kernel(x_ref, g_ref, b_ref, scale_ref, shift_ref, s_ref, ss_ref,
                     *, inv_rows, eps, r_steps):
    @pl.when(pl.program_id(0) == 0)
    def _init():
        s_ref[...] = jnp.zeros_like(s_ref)
        ss_ref[...] = jnp.zeros_like(ss_ref)

    x = x_ref[...]
    s_ref[...] += jnp.sum(x, axis=0, keepdims=True)
    ss_ref[...] += jnp.sum(x * x, axis=0, keepdims=True)

    @pl.when(pl.program_id(0) == r_steps - 1)
    def _fin():
        mean = s_ref[...] * inv_rows
        var = ss_ref[...] * inv_rows - mean * mean      # biased var (training mode)
        inv = jax.lax.rsqrt(var + eps)
        scale_ref[...] = g_ref[...] * inv
        shift_ref[...] = b_ref[...] - mean * g_ref[...] * inv


def bn_scale_shift(x, gamma, beta, eps=1e-5):
    R, C = x.shape
    tr = _pick_tile(R, 1024, 8)
    grid = (R // tr,)
    kernel = functools.partial(_bn_stats_kernel, inv_rows=1.0 / R, eps=eps,
                               r_steps=grid[0])
    return pl.pallas_call(
        kernel,
        grid=grid,
        in_specs=[
            pl.BlockSpec((tr, C), lambda i: (i, 0)),
            pl.BlockSpec((1, C), lambda i: (0, 0)),
            pl.BlockSpec((1, C), lambda i: (0, 0)),
        ],
        out_specs=(pl.BlockSpec((1, C), lambda i: (0, 0)),
                   pl.BlockSpec((1, C), lambda i: (0, 0))),
        out_shape=(jax.ShapeDtypeStruct((1, C), jnp.float32),
                   jax.ShapeDtypeStruct((1, C), jnp.float32)),
        scratch_shapes=[pltpu.VMEM((1, C), jnp.float32),
                        pltpu.VMEM((1, C), jnp.float32)],
        compiler_params=pltpu.CompilerParams(dimension_semantics=("arbitrary",)),
    )(x, gamma.reshape(1, C), beta.reshape(1, C))


def _bn_relu_kernel(x_ref, s_ref, t_ref, o_ref):
    o_ref[...] = jnp.maximum(x_ref[...] * s_ref[...] + t_ref[...], 0.0)


def bn_relu_apply(x, scale, shift):
    """Standalone BN+ReLU (used only once: after the stem conv, before maxpool)."""
    R, C = x.shape
    tr = _pick_tile(R, 1024, 8)
    grid = (R // tr,)
    return pl.pallas_call(
        _bn_relu_kernel,
        grid=grid,
        in_specs=[pl.BlockSpec((tr, C), lambda i: (i, 0)),
                  pl.BlockSpec((1, C), lambda i: (0, 0)),
                  pl.BlockSpec((1, C), lambda i: (0, 0))],
        out_specs=pl.BlockSpec((tr, C), lambda i: (i, 0)),
        out_shape=jax.ShapeDtypeStruct((R, C), jnp.float32),
        compiler_params=pltpu.CompilerParams(dimension_semantics=("parallel",)),
    )(x, scale, shift)


# ----------------------------------------------------------------------------
# Fused BN + ReLU + 3x3 conv (stride 1, pad 1, no bias), 9 taps in-kernel
# ----------------------------------------------------------------------------
_HALO = 16  # rows of zero halo on each side of the flattened batch (>= W+1, mult of 8)


def _conv3x3_kernel(x_ref, s_ref, t_ref, w_ref, m_ref, o_ref, xb_ref, *, W, C, R):
    # BN + ReLU into a zero-haloed VMEM scratch (halo rows never contribute:
    # they are zero AND masked by the per-tap validity masks).
    xb_ref[...] = jnp.zeros_like(xb_ref)
    xb_ref[_HALO:_HALO + R, :] = jnp.maximum(
        x_ref[...] * s_ref[...] + t_ref[...], 0.0)

    o_ref[...] = jnp.zeros_like(o_ref)
    for di in range(3):
        for dj in range(3):
            ti = di * 3 + dj
            sh = (di - 1) * W + (dj - 1)                      # flat-row shift of this tap
            wt = w_ref[ti * C:(ti + 1) * C, :].astype(jnp.bfloat16)
            src = xb_ref[_HALO + sh:_HALO + sh + R, :].astype(jnp.bfloat16)
            o_ref[...] += m_ref[ti] * jnp.dot(
                src, wt, preferred_element_type=jnp.float32)


def _conv3x3_masks(N, H, W):
    idx = jnp.arange(N * H * W)
    h = (idx // W) % H
    w = idx % W
    m = []
    for di in range(3):
        for dj in range(3):
            hh = h + di - 1
            ww = w + dj - 1
            m.append(((hh >= 0) & (hh < H) & (ww >= 0) & (ww < W))
                     .astype(jnp.float32))
    return jnp.stack(m, axis=0).reshape(9, N * H * W, 1)


def conv3x3_bn_relu(x, scale, shift, w9, dims):
    """x: (N*H*W, C) flat NHWC; w9: (9*C, OC).  No im2col in HBM."""
    N, H, W = dims
    R, C = x.shape
    OC = w9.shape[1]
    masks = _conv3x3_masks(N, H, W)
    kernel = functools.partial(_conv3x3_kernel, W=W, C=C, R=R)
    # TODO(synk): for activations larger than VMEM, tile over halo'd row blocks.
    return pl.pallas_call(
        kernel,
        out_shape=jax.ShapeDtypeStruct((R, OC), jnp.float32),
        scratch_shapes=[pltpu.VMEM((R + 2 * _HALO, C), jnp.float32)],
    )(x, scale, shift, w9, masks)


# ----------------------------------------------------------------------------
# Pooling kernels (in-kernel window reductions, no k*k HBM stacking)
# ----------------------------------------------------------------------------
def _maxpool3x3s2_kernel(x_ref, sel_ref, o_ref, *, OH, WT):
    for h in range(OH):
        a = None
        for di in range(3):
            for dj in range(3):
                v = x_ref[0, 2 * h + di, dj:dj + WT, :]
                a = v if a is None else jnp.maximum(a, v)
        # even-column selection (stride 2) via a 0/1 matmul (exact)
        o_ref[0, h] = jnp.dot(sel_ref[...], a, preferred_element_type=jnp.float32)


def max_pool_3x3_s2(x_nhwc):
    """MaxPool2d(kernel=3, stride=2, padding=1).  Input is post-ReLU (>= 0),
    so zero spatial padding never wins the max."""
    N, H, W, C = x_nhwc.shape
    OH, OW = H // 2, W // 2
    xp = jnp.pad(x_nhwc, ((0, 0), (1, 1), (1, 1), (0, 0)))
    sel = (jnp.arange(W)[None, :] == (2 * jnp.arange(OW))[:, None]).astype(jnp.float32)
    kernel = functools.partial(_maxpool3x3s2_kernel, OH=OH, WT=W)
    return pl.pallas_call(
        kernel,
        grid=(N,),
        in_specs=[pl.BlockSpec((1, H + 2, W + 2, C), lambda n: (n, 0, 0, 0)),
                  pl.BlockSpec((OW, W), lambda n: (0, 0))],
        out_specs=pl.BlockSpec((1, OH, OW, C), lambda n: (n, 0, 0, 0)),
        out_shape=jax.ShapeDtypeStruct((N, OH, OW, C), jnp.float32),
        compiler_params=pltpu.CompilerParams(dimension_semantics=("parallel",)),
    )(xp, sel)


def _avgpool2x2_kernel(x_ref, sel_ref, o_ref, *, OH):
    for h in range(OH):
        r = (x_ref[0, 2 * h] + x_ref[0, 2 * h + 1]) * 0.5
        o_ref[0, h] = jnp.dot(sel_ref[...], r, preferred_element_type=jnp.float32)


def avg_pool_2x2_s2(x_nhwc):
    N, H, W, C = x_nhwc.shape
    OH, OW = H // 2, W // 2
    col = jnp.arange(W)[None, :]
    row2 = (2 * jnp.arange(OW))[:, None]
    sel = ((col == row2) | (col == row2 + 1)).astype(jnp.float32) * 0.5
    kernel = functools.partial(_avgpool2x2_kernel, OH=OH)
    return pl.pallas_call(
        kernel,
        grid=(N,),
        in_specs=[pl.BlockSpec((1, H, W, C), lambda n: (n, 0, 0, 0)),
                  pl.BlockSpec((OW, W), lambda n: (0, 0))],
        out_specs=pl.BlockSpec((1, OH, OW, C), lambda n: (n, 0, 0, 0)),
        out_shape=jax.ShapeDtypeStruct((N, OH, OW, C), jnp.float32),
        compiler_params=pltpu.CompilerParams(dimension_semantics=("parallel",)),
    )(x_nhwc, sel)


# ----------------------------------------------------------------------------
# Cross-sectional attention fusion (one kernel for the whole batch)
# ----------------------------------------------------------------------------
def _fusion_kernel(f_ref, l_ref, wq_ref, bq_ref, wk_ref, bk_ref, pos_ref, o_ref,
                   ftok_ref, ltok_ref, gate_ref, *, N, H, W, scale):
    inv_h = 1.0 / H
    # width-wise cross-section tokens (mean over H) for all batch elements
    for n in range(N):
        ftok_ref[n * W:(n + 1) * W, :] = jnp.sum(f_ref[n], axis=0) * inv_h
        ltok_ref[n * W:(n + 1) * W, :] = jnp.sum(l_ref[n], axis=0) * inv_h
    # batched Q/K projections over all (n, w) tokens
    q = jnp.dot(ftok_ref[...], wq_ref[...], preferred_element_type=jnp.float32) + bq_ref[...]
    k = jnp.dot(ltok_ref[...], wk_ref[...], preferred_element_type=jnp.float32) + bk_ref[...]
    for n in range(N):
        qn = q[n * W:(n + 1) * W, :]
        kn = k[n * W:(n + 1) * W, :]
        s = jnp.dot(qn, kn.T, preferred_element_type=jnp.float32) * scale + pos_ref[...]
        s = s - jnp.max(s, axis=-1, keepdims=True)
        e = jnp.exp(s)
        attn = e * pl.reciprocal(jnp.sum(e, axis=-1, keepdims=True), approx=True)
        ctx = jnp.dot(attn, ltok_ref[n * W:(n + 1) * W, :],
                      preferred_element_type=jnp.float32)
        gate_ref[n * W:(n + 1) * W, :] = 0.5 * (jnp.tanh(0.5 * ctx) + 1.0)  # stable sigmoid
    for n in range(N):
        o_ref[n] = f_ref[n] * gate_ref[n * W:(n + 1) * W, :][None, :, :]


def cross_sectional_attention_fusion(f_flat, l_flat, dims, p):
    N, H, W = dims
    C = f_flat.shape[1]
    f = f_flat.reshape(N, H, W, C)
    l = l_flat.reshape(N, H, W, C)
    kernel = functools.partial(_fusion_kernel, N=N, H=H, W=W,
                               scale=1.0 / math.sqrt(C))
    out = pl.pallas_call(
        kernel,
        out_shape=jax.ShapeDtypeStruct((N, H, W, C), jnp.float32),
        scratch_shapes=[pltpu.VMEM((N * W, C), jnp.float32),
                        pltpu.VMEM((N * W, C), jnp.float32),
                        pltpu.VMEM((N * W, C), jnp.float32)],
    )(f, l, p["wq_t"], p["bq"], p["wk_t"], p["bk"], p["pos"])
    return out.reshape(N * H * W, C), l_flat


# ----------------------------------------------------------------------------
# Fused final BatchNorm + ReLU + global average pool
# ----------------------------------------------------------------------------
def _bn_relu_gap_kernel(x_ref, s_ref, t_ref, o_ref, *, N, inv_hw):
    for n in range(N):
        y = jnp.maximum(x_ref[n] * s_ref[...] + t_ref[...], 0.0)
        o_ref[n] = jnp.sum(y, axis=0, keepdims=True) * inv_hw


def bn_relu_global_avg_pool(x_flat, scale, shift, dims):
    N, H, W = dims
    C = x_flat.shape[1]
    x3 = x_flat.reshape(N, H * W, C)
    kernel = functools.partial(_bn_relu_gap_kernel, N=N, inv_hw=1.0 / (H * W))
    out = pl.pallas_call(
        kernel,
        out_shape=jax.ShapeDtypeStruct((N, 1, C), jnp.float32),
    )(x3, scale, shift)
    return out.reshape(N, C)


# ----------------------------------------------------------------------------
# Stem (7x7 stride-2 conv via host im2col -> tiled matmul, BN+ReLU, maxpool)
# ----------------------------------------------------------------------------
def _im2col(x_nhwc, k, stride, pad):
    N, H, W, C = x_nhwc.shape
    xp = jnp.pad(x_nhwc, ((0, 0), (pad, pad), (pad, pad), (0, 0)))
    OH = (H + 2 * pad - k) // stride + 1
    OW = (W + 2 * pad - k) // stride + 1
    cols = []
    for i in range(k):
        for j in range(k):
            cols.append(xp[:, i:i + stride * (OH - 1) + 1:stride,
                           j:j + stride * (OW - 1) + 1:stride, :])
    patches = jnp.concatenate(cols, axis=-1)            # (N, OH, OW, k*k*C)
    return patches.reshape(N * OH * OW, k * k * C), (N, OH, OW)


def stem_forward(x_nhwc, p):
    # TODO(synk): the single 7x7/stride-2 stem conv (1 input channel, runs once)
    # still uses host-side im2col; the repeated dense-block 3x3 convs do not.
    patches, dims = _im2col(x_nhwc, k=7, stride=2, pad=3)
    y = pallas_matmul(patches, p["conv0_w"])                       # (N*OH*OW, F0)
    scale, shift = bn_scale_shift(y, p["norm0_g"], p["norm0_b"])
    y = bn_relu_apply(y, scale, shift)
    N, OH, OW = dims
    C = y.shape[1]
    pooled = max_pool_3x3_s2(y.reshape(N, OH, OW, C))
    _, PH, PW, _ = pooled.shape
    return pooled.reshape(N * PH * PW, C), (N, PH, PW)


# ----------------------------------------------------------------------------
# Dense blocks / transitions
# ----------------------------------------------------------------------------
def dense_layer_forward(x, dims, p):
    s1, t1 = bn_scale_shift(x, p["n1_g"], p["n1_b"])
    y = pallas_matmul(x, p["conv1_w"], pre_scale=s1, pre_shift=t1)  # BN+ReLU+1x1 conv
    s2, t2 = bn_scale_shift(y, p["n2_g"], p["n2_b"])
    y = conv3x3_bn_relu(y, s2, t2, p["conv2_w"], dims)              # BN+ReLU+3x3 conv
    return jnp.concatenate([x, y], axis=-1)                         # channels-last concat


def transition_forward(x, dims, p):
    s, t = bn_scale_shift(x, p["g"], p["b"])
    y = pallas_matmul(x, p["conv_w"], pre_scale=s, pre_shift=t)     # BN+ReLU+1x1 conv
    N, H, W = dims
    C = y.shape[1]
    pooled = avg_pool_2x2_s2(y.reshape(N, H, W, C))
    return pooled.reshape(N * (H // 2) * (W // 2), C), (N, H // 2, W // 2)


# ----------------------------------------------------------------------------
# Parameter construction (deterministic, PyTorch-style init)
# ----------------------------------------------------------------------------
def conv_kaiming(kg, oc, ic, kh, kw):
    fan_in = ic * kh * kw
    std = math.sqrt(2.0 / fan_in)                       # kaiming_normal_
    return std * jax.random.normal(kg(), (oc, ic, kh, kw), jnp.float32)


def conv_as_matmul_weight(w):
    """(OC, IC, KH, KW) -> (KH*KW*IC, OC), matching NHWC tap/channel ordering."""
    oc, ic, kh, kw = w.shape
    return w.transpose(2, 3, 1, 0).reshape(kh * kw * ic, oc)


def linear_init(kg, out_f, in_f):
    bound = 1.0 / math.sqrt(in_f)
    w = jax.random.uniform(kg(), (out_f, in_f), jnp.float32, -bound, bound)
    b = jnp.zeros((out_f,), jnp.float32)                # nn.init.constant_(bias, 0)
    return w, b


def make_stem(kg, in_ch, f0):
    return {
        "conv0_w": conv_as_matmul_weight(conv_kaiming(kg, f0, in_ch, 7, 7)),
        "norm0_g": jnp.ones((f0,), jnp.float32),
        "norm0_b": jnp.zeros((f0,), jnp.float32),
    }


def make_dense_layer(kg, in_f, bn_size, growth):
    mid = bn_size * growth
    return {
        "n1_g": jnp.ones((in_f,), jnp.float32),
        "n1_b": jnp.zeros((in_f,), jnp.float32),
        "conv1_w": conv_as_matmul_weight(conv_kaiming(kg, mid, in_f, 1, 1)),
        "n2_g": jnp.ones((mid,), jnp.float32),
        "n2_b": jnp.zeros((mid,), jnp.float32),
        "conv2_w": conv_as_matmul_weight(conv_kaiming(kg, growth, mid, 3, 3)),
    }


def make_fusion(kg, c, width):
    wq, bq = linear_init(kg, c, c)
    wk, bk = linear_init(kg, c, c)
    return {"wq_t": wq.T, "bq": bq.reshape(1, c),
            "wk_t": wk.T, "bk": bk.reshape(1, c),
            "pos": jnp.zeros((width, width), jnp.float32)}


def init_params(kg, *, in_ch, num_init_features, growth, bn_size, block_config,
                num_classes, image_width):
    params = {}
    params["frontal_stem"] = make_stem(kg, in_ch, num_init_features)
    params["lateral_stem"] = make_stem(kg, in_ch, num_init_features)

    width = image_width // 4
    params["input_fusion"] = make_fusion(kg, num_init_features, width)
    # fusion_index = 0 -> lateral stream has no dense blocks; block_fusions
    # exist in the PyTorch module but never touch the returned frontal logits.

    blocks = []
    num_features = num_init_features
    for i, num_layers in enumerate(block_config):
        layers = []
        for _ in range(num_layers):
            layers.append(make_dense_layer(kg, num_features, bn_size, growth))
            num_features += growth
        blk = {"layers": layers, "transition": None}
        if i != len(block_config) - 1:
            blk["transition"] = {
                "g": jnp.ones((num_features,), jnp.float32),
                "b": jnp.zeros((num_features,), jnp.float32),
                "conv_w": conv_as_matmul_weight(
                    conv_kaiming(kg, num_features // 2, num_features, 1, 1)),
            }
            num_features //= 2
        blocks.append(blk)
    params["frontal_blocks"] = blocks

    params["final_g"] = jnp.ones((num_features,), jnp.float32)
    params["final_b"] = jnp.zeros((num_features,), jnp.float32)
    cls_w, cls_b = linear_init(kg, num_classes, num_features)
    params["cls_w_t"] = cls_w.T
    params["cls_b"] = cls_b
    return params


# ----------------------------------------------------------------------------
# Forward pass
# ----------------------------------------------------------------------------
def model_forward(frontal_nchw, lateral_nchw, params):
    # single layout conversion at model entry: NCHW -> NHWC (channels on lanes)
    frontal = frontal_nchw.transpose(0, 2, 3, 1)
    lateral = lateral_nchw.transpose(0, 2, 3, 1)

    ff, dims = stem_forward(frontal, params["frontal_stem"])
    lf, _ = stem_forward(lateral, params["lateral_stem"])
    ff, _ = cross_sectional_attention_fusion(ff, lf, dims, params["input_fusion"])

    # fusion_index = 0: all frontal dense blocks run without further fusion.
    for blk in params["frontal_blocks"]:
        for lp in blk["layers"]:
            ff = dense_layer_forward(ff, dims, lp)
        if blk["transition"] is not None:
            ff, dims = transition_forward(ff, dims, blk["transition"])

    scale, shift = bn_scale_shift(ff, params["final_g"], params["final_b"])
    pooled = bn_relu_global_avg_pool(ff, scale, shift, dims)        # (N, C)
    return pallas_matmul(pooled, params["cls_w_t"], bias=params["cls_b"])


# ----------------------------------------------------------------------------
# Main
# ----------------------------------------------------------------------------
if __name__ == "__main__":
    # Small shapes: batch=2, grayscale 32x32 views; DenseNet scaled down.
    NUM_CLASSES = 10
    cfg = dict(in_ch=1, num_init_features=8, growth=4, bn_size=2,
               block_config=(2, 2), num_classes=NUM_CLASSES, image_width=32)

    params = init_params(KeyGen(1), **cfg)

    k1, k2 = jax.random.split(jax.random.PRNGKey(0))
    frontal = jax.random.normal(k1, (2, 1, 32, 32), jnp.float32)
    lateral = jax.random.normal(k2, (2, 1, 32, 32), jnp.float32)

    logits = model_forward(frontal, lateral, params)
    logits = jax.block_until_ready(logits)
    assert logits.shape == (2, NUM_CLASSES)
    assert bool(jnp.all(jnp.isfinite(logits)))
    print("KERNEL_OK")
</pallas_src>

<mosaic_0001>
module attributes {stable_mosaic.version = 11 : i64} {
  func.func @_mm_kernel(%arg0: i32, %arg1: i32, %arg2: i32, %arg3: memref<256x49xf32, #tpu.memory_space<vmem>>, %arg4: memref<49x8xf32, #tpu.memory_space<vmem>>, %arg5: memref<1x49xf32, #tpu.memory_space<vmem>>, %arg6: memref<1x49xf32, #tpu.memory_space<vmem>>, %arg7: memref<1x8xf32, #tpu.memory_space<vmem>>, %arg8: memref<256x8xf32, #tpu.memory_space<vmem>>, %arg9: memref<256x8xf32, #tpu.memory_space<vmem>>) attributes {dimension_semantics = [#tpu.dimension_semantics<parallel>, #tpu.dimension_semantics<parallel>, #tpu.dimension_semantics<arbitrary>], iteration_bounds = array<i64: 2, 1, 1>, scalar_prefetch = 0 : i64, scratch_operands = 1 : i64, tpu.core_type = #tpu.core_type<tc>, window_params = [{transform_indices = @transform_0, window_bounds = array<i64: 256, 49>}, {transform_indices = @transform_1, window_bounds = array<i64: 49, 8>}, {transform_indices = @transform_2, window_bounds = array<i64: 1, 49>}, {transform_indices = @transform_3, window_bounds = array<i64: 1, 49>}, {transform_indices = @transform_4, window_bounds = array<i64: 1, 8>}, {transform_indices = @transform_5, window_bounds = array<i64: 256, 8>}]} {
    %c0_i32 = arith.constant 0 : i32
    %0 = arith.cmpi eq, %arg2, %c0_i32 : i32
    %1 = arith.extui %0 : i1 to i32
    %c0_i32_0 = arith.constant 0 : i32
    %2 = arith.cmpi ne, %1, %c0_i32_0 : i32
    scf.if %2 {
      %cst_14 = arith.constant 0.000000e+00 : f32
      %20 = vector.broadcast %cst_14 : f32 to vector<256x8xf32>
      %c0_15 = arith.constant 0 : index
      %c0_16 = arith.constant 0 : index
      %21 = vector.load %arg9[%c0_15, %c0_16] : memref<256x8xf32, #tpu.memory_space<vmem>>, vector<256x8xf32>
      tpu.vector_store %arg9[%c0_15, %c0_16], %20 {strides = array<i32>} : memref<256x8xf32, #tpu.memory_space<vmem>>, vector<256x8xf32>,
    } else {
    }
    %c0 = arith.constant 0 : index
    %c0_1 = arith.constant 0 : index
    %3 = vector.load %arg3[%c0, %c0_1] : memref<256x49xf32, #tpu.memory_space<vmem>>, vector<256x49xf32>
    %c0_2 = arith.constant 0 : index
    %c0_3 = arith.constant 0 : index
    %4 = vector.load %arg5[%c0_2, %c0_3] : memref<1x49xf32, #tpu.memory_space<vmem>>, vector<1x49xf32>
    %5 = vector.broadcast %4 : vector<1x49xf32> to vector<256x49xf32>
    %6 = arith.mulf %3, %5 : vector<256x49xf32>
    %c0_4 = arith.constant 0 : index
    %c0_5 = arith.constant 0 : index
    %7 = vector.load %arg6[%c0_4, %c0_5] : memref<1x49xf32, #tpu.memory_space<vmem>>, vector<1x49xf32>
    %8 = vector.broadcast %7 : vector<1x49xf32> to vector<256x49xf32>
    %9 = arith.addf %6, %8 : vector<256x49xf32>
    %c0_6 = arith.constant 0 : index
    %c0_7 = arith.constant 0 : index
    %10 = vector.load %arg9[%c0_6, %c0_7] : memref<256x8xf32, #tpu.memory_space<vmem>>, vector<256x8xf32>
    %11 = arith.truncf %9 : vector<256x49xf32> to vector<256x49xbf16>
    %c0_8 = arith.constant 0 : index
    %c0_9 = arith.constant 0 : index
    %12 = vector.load %arg4[%c0_8, %c0_9] : memref<49x8xf32, #tpu.memory_space<vmem>>, vector<49x8xf32>
    %13 = arith.truncf %12 : vector<49x8xf32> to vector<49x8xbf16>
    %cst = arith.constant dense<0.000000e+00> : vector<256x8xf32>
    %14 = tpu.matmul %11, %13, %cst {dimension_numbers = #tpu.dot_dimension_numbers<[1], [0], [0], [1], [0, 0, 1, 1], [], []>} : vector<256x49xbf16>, vector<49x8xbf16>, vector<256x8xf32> -> vector<256x8xf32>
    %15 = arith.addf %10, %14 : vector<256x8xf32>
    %c0_10 = arith.constant 0 : index
    %c0_11 = arith.constant 0 : index
    %16 = vector.load %arg9[%c0_10, %c0_11] : memref<256x8xf32, #tpu.memory_space<vmem>>, vector<256x8xf32>
    tpu.vector_store %arg9[%c0_10, %c0_11], %15 {strides = array<i32>} : memref<256x8xf32, #tpu.memory_space<vmem>>, vector<256x8xf32>,
    %c0_i32_12 = arith.constant 0 : i32
    %17 = arith.cmpi eq, %arg2, %c0_i32_12 : i32
    %18 = arith.extui %17 : i1 to i32
    %c0_i32_13 = arith.constant 0 : i32
    %19 = arith.cmpi ne, %18, %c0_i32_13 : i32
    scf.if %19 {
      %c0_14 = arith.constant 0 : index
      %c0_15 = arith.constant 0 : index
      %20 = vector.load %arg9[%c0_14, %c0_15] : memref<256x8xf32, #tpu.memory_space<vmem>>, vector<256x8xf32>
      %c0_16 = arith.constant 0 : index
      %c0_17 = arith.constant 0 : index
      %21 = vector.load %arg7[%c0_16, %c0_17] : memref<1x8xf32, #tpu.memory_space<vmem>>, vector<1x8xf32>
      %22 = vector.broadcast %21 : vector<1x8xf32> to vector<256x8xf32>
      %23 = arith.addf %20, %22 : vector<256x8xf32>
      %c0_18 = arith.constant 0 : index
      %c0_19 = arith.constant 0 : index
      %24 = vector.load %arg8[%c0_18, %c0_19] : memref<256x8xf32, #tpu.memory_space<vmem>>, vector<256x8xf32>
      tpu.vector_store %arg8[%c0_18, %c0_19], %23 {strides = array<i32>} : memref<256x8xf32, #tpu.memory_space<vmem>>, vector<256x8xf32>,
    } else {
    }
    return
  }
  func.func @transform_0(%arg0: i32, %arg1: i32, %arg2: i32) -> (i32, i32) {
    %c0_i32 = arith.constant 0 : i32
    return %arg0, %arg2 : i32, i32
  }
  func.func @transform_1(%arg0: i32, %arg1: i32, %arg2: i32) -> (i32, i32) {
    %c0_i32 = arith.constant 0 : i32
    return %arg2, %arg1 : i32, i32
  }
  func.func @transform_2(%arg0: i32, %arg1: i32, %arg2: i32) -> (i32, i32) {
    %c0_i32 = arith.constant 0 : i32
    %c0_i32_0 = arith.constant 0 : i32
    return %c0_i32, %arg2 : i32, i32
  }
  func.func @transform_3(%arg0: i32, %arg1: i32, %arg2: i32) -> (i32, i32) {
    %c0_i32 = arith.constant 0 : i32
    %c0_i32_0 = arith.constant 0 : i32
    return %c0_i32, %arg2 : i32, i32
  }
  func.func @transform_4(%arg0: i32, %arg1: i32, %arg2: i32) -> (i32, i32) {
    %c0_i32 = arith.constant 0 : i32
    %c0_i32_0 = arith.constant 0 : i32
    return %c0_i32, %arg1 : i32, i32
  }
  func.func @transform_5(%arg0: i32, %arg1: i32, %arg2: i32) -> (i32, i32) {
    %c0_i32 = arith.constant 0 : i32
    return %arg0, %arg1 : i32, i32
  }
}

</mosaic_0001>

<bundles_post_ra>
// kernel: tpu_custom_call.1
= control target key start
LH: loop header
LB: loop body
LE: loop exit
PB: predicated region body
PF: predicated region fallthrough
CT: control target
= control target key end

     0   :  { %s1117_s18 = smov 0   ;;  %s1119_s19 = smov 0   ;;  %s1501_s0 = inlined_call_operand.vmem [shape: f32[512,49], index: 0, kind: input, shape index: {}]   ;;  %s1502_s1 = inlined_call_operand.vmem [shape: f32[49,8], index: 1, kind: input, shape index: {}]   ;;  %s1503_s2 = inlined_call_operand.vmem [shape: f32[1,49], index: 2, kind: input, shape index: {}]   ;;  %s1504_s3 = inlined_call_operand.vmem [shape: f32[1,49], index: 3, kind: input, shape index: {}]   ;;  %s1505_s4 = inlined_call_operand.vmem [shape: f32[1,8], index: 4, kind: input, shape index: {}]   ;;  %s1506_s5 = inlined_call_operand.vmem [shape: f32[512,8], index: 5, kind: output, shape index: {}]  }
   0x1   :  { %s1121_s20 = smov 0  }
   0x2 LB: > { %s34_s21 = sadd.s32 1, %s1079_s19  ;;  %p997_p0 = scmp.ge.s32.totalorder %s1083_s20, 1  ;;  %s1083_s20 = sphi %s1121_s20, %s15_s20   ;;  %s1079_s19 = sphi %s1119_s19, %s1508_s19   ;;  %s1075_s18 = sphi %s1117_s18, %s1507_s18  }
   0x3   : > { %p36_p1 = scmp.ge.s32.totalorder %s34_s21, 2  ;;  %p254_p2 = scmp.lt.s32.totalorder %s1083_s20, 3 }
   0x5   : > { %s1510_s21 = smov (%p36_p1, %s34_s21), 0  ;;  %p255_p3 = pnand %p997_p0, %p254_p2 }
   0x6   : > { %s998_s24 = sshll.u32 (!%p255_p3), %s1075_s18, 5 }
   0x7   : > { %258 = sbr.rel (%p255_p3) target bundleno = 235 (0xeb), region = 40  ;;  %p306_p4 = scmp.lt.s32.totalorder (!%p255_p3), %s998_s24, 63 }
   0xc   : > { %v537_v0 = vld [vmem:[%s1502_s1 + $0x30] sm:$0x1]  ;;  %vm591_vm0 = vcmask 1040384   ;;  %v1085_v2 = vmov 0   ;;  %v535_v4 = vld [vmem:[%s1502_s1 + $0x20] sm:$0xff]  ;;  %v536_v5 = vld [vmem:[%s1502_s1 + $0x28] sm:$0xff] }
   0xd   : > { %v541_v1 = vpack.c.bf16 %v537_v0, %v537_v0  ;;  %v593_v3 = vsel %vm591_vm0, 65535, %v1085_v2  ;;  %s1512_s24 = smov (!%p306_p4, %s998_s24), 63  ;;  %v540_v7 = vpack.c.bf16 %v536_v5, %v535_v4  ;;  %v533_v8 = vld [vmem:[%s1502_s1 + $0x10] sm:$0xff]  ;;  %v534_v9 = vld [vmem:[%s1502_s1 + $0x18] sm:$0xff]  ;;  %v1155_v10 = vld [vmem:[%s1503_s2] ss:$0 sm:$0xff] }
   0xe   : > { %s999_s10 = sshll.u32 %s1512_s24, 3  ;;  %v531_v11 = vld [vmem:[%s1502_s1] sm:$0xff]  ;;  %v532_v12 = vld [vmem:[%s1502_s1 + $0x8] sm:$0xff]  ;;  %v539_v14 = vpack.c.bf16 %v534_v9, %v533_v8  ;;  %vm542_vm1 = vcmask 400384   ;;  %vm346_vm2 = vcmask 64512  }
   0xf   : > { %v595_v6 = vand.u32 %v593_v3, %v541_v1  ;;  %s1169_s17 = scalar_lea.vmem %s1501_s0, %s999_s10  ;;  %v1174_v13 = vld [vmem:[%s1504_s3] ss:$0 sm:$0xff]  ;;  %v538_v29 = vpack.c.bf16 %v532_v12, %v531_v11  ;;  %s1364_s28 = scalar_lea.vmem %s1506_s5, %s999_s10 }
  0x10   : > { %v379_v15 = vld [vmem:[%s1169_s17] sm:$0xff]  ;;  %v380_v16 = vld [vmem:[%s1169_s17 + $0x8] sm:$0xff]  ;;  %v381_v44 = vld [vmem:[%s1169_s17 + $0x10] sm:$0xff] }
  0x11   : > { %601 = vmatpush.bf16.msra.mxu0 %v595_v6  ;;  %1020 = vmatpush.bf16.msra.mxu1 %v595_v6  ;;  %v387_v17 = vld [vmem:[%s1169_s17 + $0x40] sm:$0xff]  ;;  %v415_v18 = vmul.f32 %v1155_v10, %v379_v15  ;;  %v416_v19 = vmul.f32 %v1155_v10, %v380_v16  ;;  %v388_v20 = vld [vmem:[%s1169_s17 + $0x48] sm:$0xff]  ;;  %v382_v45 = vld [vmem:[%s1169_s17 + $0x18] sm:$0xff]  ;;  %v417_v52 = vmul.f32 %v1155_v10, %v381_v44 }
  0x12   : > { %1021 = vmatpush.bf16.msra.mxu2 %v595_v6  ;;  %1022 = vmatpush.bf16.msra.mxu3 %v595_v6  ;;  %v423_v21 = vmul.f32 %v1155_v10, %v387_v17  ;;  %v395_v22 = vld [vmem:[%s1169_s17 + $0x80] sm:$0xff]  ;;  %v396_v23 = vld [vmem:[%s1169_s17 + $0x88] sm:$0xff]  ;;  %v424_v24 = vmul.f32 %v1155_v10, %v388_v20  ;;  %v389_v46 = vld [vmem:[%s1169_s17 + $0x50] sm:$0xff]  ;;  %v418_v53 = vmul.f32 %v1155_v10, %v382_v45 }
  0x13   : > { %v431_v25 = vmul.f32 %v1155_v10, %v395_v22  ;;  %v432_v26 = vmul.f32 %v1155_v10, %v396_v23  ;;  %v403_v27 = vld [vmem:[%s1169_s17 + $0xc0] sm:$0xff]  ;;  %v404_v28 = vld [vmem:[%s1169_s17 + $0xc8] sm:$0xff]  ;;  %v451_v30 = vadd.f32 %v1174_v13, %v415_v18  ;;  %v452_v32 = vadd.f32 %v1174_v13, %v416_v19  ;;  %v390_v47 = vld [vmem:[%s1169_s17 + $0x58] sm:$0xff] }
  0x14   : > { %v439_v31 = vmul.f32 %v1155_v10, %v403_v27  ;;  %v459_v33 = vadd.f32 %v1174_v13, %v423_v21  ;;  %v460_v34 = vadd.f32 %v1174_v13, %v424_v24  ;;  %v440_v35 = vmul.f32 %v1155_v10, %v404_v28  ;;  %v397_v48 = vld [vmem:[%s1169_s17 + $0x90] sm:$0xff]  ;;  %v398_v49 = vld [vmem:[%s1169_s17 + $0x98] sm:$0xff]  ;;  %v383_v8 = vld [vmem:[%s1169_s17 + $0x20] sm:$0xff] }
  0x15   : > { %602 = vmatpush.bf16.msra.mxu0 %v540_v7  ;;  %1023 = vmatpush.bf16.msra.mxu1 %v540_v7  ;;  %v467_v36 = vadd.f32 %v1174_v13, %v431_v25  ;;  %v468_v37 = vadd.f32 %v1174_v13, %v432_v26  ;;  %v515_v40 = vpack.c.bf16 %v452_v32, %v451_v30  ;;  %v405_v50 = vld [vmem:[%s1169_s17 + $0xd0] sm:$0xff]  ;;  %v406_v51 = vld [vmem:[%s1169_s17 + $0xd8] sm:$0xff]  ;;  %v384_v9 = vld [vmem:[%s1169_s17 + $0x28] sm:$0xff]  ;;  %v1086_v18 = vmov 0.0  }
  0x16   : > { %1024 = vmatpush.bf16.msra.mxu2 %v540_v7  ;;  %1025 = vmatpush.bf16.msra.mxu3 %v540_v7  ;;  %v475_v38 = vadd.f32 %v1174_v13, %v439_v31  ;;  %v476_v39 = vadd.f32 %v1174_v13, %v440_v35  ;;  %v519_v41 = vpack.c.bf16 %v460_v34, %v459_v33  ;;  %v391_v11 = vld [vmem:[%s1169_s17 + $0x60] sm:$0xff]  ;;  %v392_v12 = vld [vmem:[%s1169_s17 + $0x68] sm:$0xff]  ;;  %v402_v44 = vld [vmem:[%s1169_s17 + $0xb8] sm:$0xff] }
  0x17   : > { %v523_v42 = vpack.c.bf16 %v468_v37, %v467_v36  ;;  %v425_v54 = vmul.f32 %v1155_v10, %v389_v46  ;;  %v426_v55 = vmul.f32 %v1155_v10, %v390_v47  ;;  %v433_v56 = vmul.f32 %v1155_v10, %v397_v48  ;;  %v400_v15 = vld [vmem:[%s1169_s17 + $0xa8] sm:$0xff]  ;;  %v407_v16 = vld [vmem:[%s1169_s17 + $0xe0] sm:$0xff]  ;;  %347 = vst.msk [vmem:[#allocation2] sm:$0xff] %vm346_vm2, %v1086_v18  ;;  %v409_v45 = vld [vmem:[%s1169_s17 + $0xf0] sm:$0xff] }
  0x18   : > { %v527_v43 = vpack.c.bf16 %v476_v39, %v475_v38  ;;  %v434_v57 = vmul.f32 %v1155_v10, %v398_v49  ;;  %v441_v58 = vmul.f32 %v1155_v10, %v405_v50  ;;  %v442_v59 = vmul.f32 %v1155_v10, %v406_v51  ;;  %v408_v17 = vld [vmem:[%s1169_s17 + $0xe8] sm:$0xff]  ;;  %348 = vst.msk [vmem:[#allocation2 + $0x8] sm:$0xff] %vm346_vm2, %v1086_v18  ;;  %v385_v39 = vld [vmem:[%s1169_s17 + $0x30] sm:$0xff]  ;;  %v410_v46 = vld [vmem:[%s1169_s17 + $0xf8] sm:$0xff] }
  0x19   : > { %603 = vmatpush.bf16.msra.mxu0 %v539_v14  ;;  %1026 = vmatpush.bf16.msra.mxu1 %v539_v14  ;;  %v453_v60 = vadd.f32 %v1174_v13, %v417_v52  ;;  %v454_v61 = vadd.f32 %v1174_v13, %v418_v53  ;;  %v461_v62 = vadd.f32 %v1174_v13, %v425_v54 }
  0x1a   : > { %1027 = vmatpush.bf16.msra.mxu2 %v539_v14  ;;  %1028 = vmatpush.bf16.msra.mxu3 %v539_v14  ;;  %v462_v63 = vadd.f32 %v1174_v13, %v426_v55  ;;  %v469_v0 = vadd.f32 %v1174_v13, %v433_v56  ;;  %v470_v1 = vadd.f32 %v1174_v13, %v434_v57  ;;  %v399_v14 = vld [vmem:[%s1169_s17 + $0xa0] sm:$0xff] }
  0x1b   : > { %v477_v2 = vadd.f32 %v1174_v13, %v441_v58  ;;  %v478_v3 = vadd.f32 %v1174_v13, %v442_v59  ;;  %v516_v4 = vpack.c.bf16 %v454_v61, %v453_v60  ;;  %v419_v19 = vmul.f32 %v1155_v10, %v383_v8  ;;  %349 = vst.msk [vmem:[#allocation2 + $0x10] sm:$0xff] %vm346_vm2, %v1086_v18 }
  0x1c   : > { %v520_v5 = vpack.c.bf16 %v462_v63, %v461_v62  ;;  %v524_v6 = vpack.c.bf16 %v470_v1, %v469_v0  ;;  %v420_v20 = vmul.f32 %v1155_v10, %v384_v9  ;;  %v427_v21 = vmul.f32 %v1155_v10, %v391_v11  ;;  %350 = vst.msk [vmem:[#allocation2 + $0x18] sm:$0xff] %vm346_vm2, %v1086_v18  ;;  %v1357_v11 = vld [vmem:[%s1505_s4] ss:$0 sm:$0xff] }
  0x1d   : > { %604 = vmatpush.bf16.msra.mxu0 %v538_v29  ;;  %1029 = vmatpush.bf16.msra.mxu1 %v538_v29  ;;  %v528_v7 = vpack.c.bf16 %v478_v3, %v477_v2  ;;  %v428_v22 = vmul.f32 %v1155_v10, %v392_v12  ;;  %v435_v23 = vmul.f32 %v1155_v10, %v399_v14 }
  0x1e   : > { %1030 = vmatpush.bf16.msra.mxu2 %v538_v29  ;;  %1031 = vmatpush.bf16.msra.mxu3 %v538_v29  ;;  %v436_v24 = vmul.f32 %v1155_v10, %v400_v15  ;;  %v443_v25 = vmul.f32 %v1155_v10, %v407_v16  ;;  %v444_v26 = vmul.f32 %v1155_v10, %v408_v17 }
  0x1f   : > { %351 = vst.msk [vmem:[#allocation2 + $0x20] sm:$0xff] %vm346_vm2, %v1086_v18  ;;  %v455_v27 = vadd.f32 %v1174_v13, %v419_v19  ;;  %v456_v28 = vadd.f32 %v1174_v13, %v420_v20  ;;  %v463_v29 = vadd.f32 %v1174_v13, %v427_v21  ;;  %v464_v30 = vadd.f32 %v1174_v13, %v428_v22  ;;  %v484_v9 = vld [vmem:[#allocation2 + $0x8] sm:$0xff] }
  0x20   : > { %1002 = vmatmul.msk.bf16.vlgmr.msra.gmra.mxu0 %vm542_vm1, %v515_v40  ;;  %1006 = vmatmul.msk.bf16.vlgmr.msra.gmra.mxu1 %vm542_vm1, %v519_v41  ;;  %352 = vst.msk [vmem:[#allocation2 + $0x28] sm:$0xff] %vm346_vm2, %v1086_v18  ;;  %v471_v31 = vadd.f32 %v1174_v13, %v435_v23  ;;  %v472_v32 = vadd.f32 %v1174_v13, %v436_v24  ;;  %v386_v40 = vld [vmem:[%s1169_s17 + $0x38] sm:$0xff]  ;;  %v393_v41 = vld [vmem:[%s1169_s17 + $0x70] sm:$0xff] }
  0x21   : > { %1010 = vmatmul.msk.bf16.vlgmr.msra.gmra.mxu2 %vm542_vm1, %v523_v42  ;;  %1014 = vmatmul.msk.bf16.vlgmr.msra.gmra.mxu3 %vm542_vm1, %v527_v43  ;;  %353 = vst.msk [vmem:[#allocation2 + $0x30] sm:$0xff] %vm346_vm2, %v1086_v18  ;;  %v479_v33 = vadd.f32 %v1174_v13, %v443_v25  ;;  %v480_v34 = vadd.f32 %v1174_v13, %v444_v26  ;;  %v394_v42 = vld [vmem:[%s1169_s17 + $0x78] sm:$0xff]  ;;  %v401_v43 = vld [vmem:[%s1169_s17 + $0xb0] sm:$0xff] }
  0x22   : > { %354 = vst.msk [vmem:[#allocation2 + $0x38] sm:$0xff] %vm346_vm2, %v1086_v18  ;;  %v517_v35 = vpack.c.bf16 %v456_v28, %v455_v27  ;;  %v521_v36 = vpack.c.bf16 %v464_v30, %v463_v29  ;;  %v525_v37 = vpack.c.bf16 %v472_v32, %v471_v31  ;;  %v421_v47 = vmul.f32 %v1155_v10, %v385_v39  ;;  %v485_v32 = vld [vmem:[#allocation2 + $0x10] sm:$0xff] }
  0x23   : > { %355 = vst.msk [vmem:[#allocation2 + $0x40] sm:$0xff] %vm346_vm2, %v1086_v18  ;;  %v529_v38 = vpack.c.bf16 %v480_v34, %v479_v33  ;;  %v422_v48 = vmul.f32 %v1155_v10, %v386_v40  ;;  %v429_v49 = vmul.f32 %v1155_v10, %v393_v41  ;;  %v430_v50 = vmul.f32 %v1155_v10, %v394_v42 }
  0x24   : > { %356 = vst.msk [vmem:[#allocation2 + $0x48] sm:$0xff] %vm346_vm2, %v1086_v18  ;;  %v437_v51 = vmul.f32 %v1155_v10, %v401_v43  ;;  %v438_v52 = vmul.f32 %v1155_v10, %v402_v44  ;;  %v445_v53 = vmul.f32 %v1155_v10, %v409_v45  ;;  %v446_v54 = vmul.f32 %v1155_v10, %v410_v46 }
  0x25   : > { %357 = vst.msk [vmem:[#allocation2 + $0x50] sm:$0xff] %vm346_vm2, %v1086_v18  ;;  %v457_v55 = vadd.f32 %v1174_v13, %v421_v47  ;;  %v458_v56 = vadd.f32 %v1174_v13, %v422_v48  ;;  %v465_v57 = vadd.f32 %v1174_v13, %v429_v49  ;;  %v466_v58 = vadd.f32 %v1174_v13, %v430_v50  ;;  %v486_v50 = vld [vmem:[#allocation2 + $0x18] sm:$0xff] }
  0x26   : > { %358 = vst.msk [vmem:[#allocation2 + $0x58] sm:$0xff] %vm346_vm2, %v1086_v18  ;;  %v473_v10 = vadd.f32 %v1174_v13, %v437_v51  ;;  %v474_v59 = vadd.f32 %v1174_v13, %v438_v52  ;;  %v481_v60 = vadd.f32 %v1174_v13, %v445_v53  ;;  %v482_v61 = vadd.f32 %v1174_v13, %v446_v54  ;;  %v483_v13 = vld [vmem:[#allocation2] sm:$0xff] }
  0x27   : > { %359 = vst.msk [vmem:[#allocation2 + $0x60] sm:$0xff] %vm346_vm2, %v1086_v18  ;;  %v518_v62 = vpack.c.bf16 %v458_v56, %v457_v55  ;;  %v522_v63 = vpack.c.bf16 %v466_v58, %v465_v57 }
  0x28   : > { %360 = vst.msk [vmem:[#allocation2 + $0x68] sm:$0xff] %vm346_vm2, %v1086_v18  ;;  %v526_v0 = vpack.c.bf16 %v474_v59, %v473_v10  ;;  %v530_v1 = vpack.c.bf16 %v482_v61, %v481_v60 }
  0x29   : > { %361 = vst.msk [vmem:[#allocation2 + $0x70] sm:$0xff] %vm346_vm2, %v1086_v18 }
  0x2a   : > { %362 = vst.msk [vmem:[#allocation2 + $0x78] sm:$0xff] %vm346_vm2, %v1086_v18  ;;  %v491_v2 = vld [vmem:[#allocation2 + $0x40] sm:$0xff] }
  0x2b   : > { %363 = vst.msk [vmem:[#allocation2 + $0x80] sm:$0xff] %vm346_vm2, %v1086_v18 }
  0x2c   : > { %364 = vst.msk [vmem:[#allocation2 + $0x88] sm:$0xff] %vm346_vm2, %v1086_v18 }
  0x2d   : > { %365 = vst.msk [vmem:[#allocation2 + $0x90] sm:$0xff] %vm346_vm2, %v1086_v18  ;;  %v494_v54 = vld [vmem:[#allocation2 + $0x58] sm:$0xff] }
  0x2e   : > { %366 = vst.msk [vmem:[#allocation2 + $0x98] sm:$0xff] %vm346_vm2, %v1086_v18 }
  0x2f   : > { %367 = vst.msk [vmem:[#allocation2 + $0xa0] sm:$0xff] %vm346_vm2, %v1086_v18 }
  0x30   : > { %1003 = vmatmul.msk.bf16.gmra.mxu0 %vm542_vm1, %v516_v4  ;;  %1007 = vmatmul.msk.bf16.gmra.mxu1 %vm542_vm1, %v520_v5  ;;  %368 = vst.msk [vmem:[#allocation2 + $0xa8] sm:$0xff] %vm346_vm2, %v1086_v18 }
  0x31   : > { %1011 = vmatmul.msk.bf16.gmra.mxu2 %vm542_vm1, %v524_v6  ;;  %1015 = vmatmul.msk.bf16.gmra.mxu3 %vm542_vm1, %v528_v7  ;;  %369 = vst.msk [vmem:[#allocation2 + $0xb0] sm:$0xff] %vm346_vm2, %v1086_v18 }
  0x32   : > { %370 = vst.msk [vmem:[#allocation2 + $0xb8] sm:$0xff] %vm346_vm2, %v1086_v18  ;;  %v499_v7 = vld [vmem:[#allocation2 + $0x80] sm:$0xff] }
  0x33   : > { %371 = vst.msk [vmem:[#allocation2 + $0xc0] sm:$0xff] %vm346_vm2, %v1086_v18  ;;  %v500_v26 = vld [vmem:[#allocation2 + $0x88] sm:$0xff] }
  0x34   : > { %372 = vst.msk [vmem:[#allocation2 + $0xc8] sm:$0xff] %vm346_vm2, %v1086_v18  ;;  %v501_v44 = vld [vmem:[#allocation2 + $0x90] sm:$0xff] }
  0x35   : > { %373 = vst.msk [vmem:[#allocation2 + $0xd0] sm:$0xff] %vm346_vm2, %v1086_v18  ;;  %v502_v61 = vld [vmem:[#allocation2 + $0x98] sm:$0xff] }
  0x36   : > { %374 = vst.msk [vmem:[#allocation2 + $0xd8] sm:$0xff] %vm346_vm2, %v1086_v18 }
  0x37   : > { %375 = vst.msk [vmem:[#allocation2 + $0xe0] sm:$0xff] %vm346_vm2, %v1086_v18 }
  0x38   : > { %376 = vst.msk [vmem:[#allocation2 + $0xe8] sm:$0xff] %vm346_vm2, %v1086_v18 }
  0x39   : > { %377 = vst.msk [vmem:[#allocation2 + $0xf0] sm:$0xff] %vm346_vm2, %v1086_v18 }
  0x3a   : > { %378 = vst.msk [vmem:[#allocation2 + $0xf8] sm:$0xff] %vm346_vm2, %v1086_v18  ;;  %v507_v8 = vld [vmem:[#allocation2 + $0xc0] sm:$0xff]  ;;  %v492_v18 = vld [vmem:[#allocation2 + $0x48] sm:$0xff] }
  0x3b   : > { %v508_v27 = vld [vmem:[#allocation2 + $0xc8] sm:$0xff] }
  0x3c   : > { %v509_v45 = vld [vmem:[#allocation2 + $0xd0] sm:$0xff] }
  0x40   : > { %1004 = vmatmul.msk.bf16.gmra.mxu0 %vm542_vm1, %v517_v35  ;;  %1008 = vmatmul.msk.bf16.gmra.mxu1 %vm542_vm1, %v521_v36  ;;  %v493_v36 = vld [vmem:[#allocation2 + $0x50] sm:$0xff] }
  0x41   : > { %1012 = vmatmul.msk.bf16.gmra.mxu2 %vm542_vm1, %v525_v37  ;;  %1016 = vmatmul.msk.bf16.gmra.mxu3 %vm542_vm1, %v529_v38 }
  0x50   : > { %1005 = vmatmul.msk.bf16.gmra.mxu0 %vm542_vm1, %v518_v62  ;;  %1009 = vmatmul.msk.bf16.gmra.mxu1 %vm542_vm1, %v522_v63 }
  0x51   : > { %1013 = vmatmul.msk.bf16.gmra.mxu2 %vm542_vm1, %v526_v0  ;;  %1017 = vmatmul.msk.bf16.gmra.mxu3 %vm542_vm1, %v530_v1 }
  0x9d   : > { %v606_v3 = vpop.f32.mrf.mxu0  ;;  %v626_v4 = vpop.f32.mrf.mxu1 }
  0x9e   : > { %v686_v5 = vadd.f32 %v606_v3, %v483_v13  ;;  %v694_v6 = vadd.f32 %v626_v4, %v491_v2  ;;  %v510_v13 = vld [vmem:[#allocation2 + $0xd8] sm:$0xff] }
  0xa0   : > { %719 = vst.msk [vmem:[#allocation2] sm:$0xff] %vm346_vm2, %v686_v5  ;;  %v487_v5 = vld [vmem:[#allocation2 + $0x20] sm:$0xff] }
  0xa1   : > { %727 = vst.msk [vmem:[#allocation2 + $0x40] sm:$0xff] %vm346_vm2, %v694_v6 }
  0xa4   : > { %v646_v12 = vpop.f32.mrf.mxu2  ;;  %v666_v14 = vpop.f32.mrf.mxu3 }
  0xa5   : > { %v702_v15 = vadd.f32 %v646_v12, %v499_v7  ;;  %v710_v16 = vadd.f32 %v666_v14, %v507_v8  ;;  %v608_v17 = vpop.f32.mrf.mxu0  ;;  %v628_v19 = vpop.f32.mrf.mxu1 }
  0xa6   : > { %v687_v20 = vadd.f32 %v608_v17, %v484_v9  ;;  %v695_v24 = vadd.f32 %v628_v19, %v492_v18  ;;  %v495_v17 = vld [vmem:[#allocation2 + $0x60] sm:$0xff] }
  0xa7   : > { %v754_v21 = vld [vmem:[#allocation2] sm:$0xff]  ;;  %735 = vst.msk [vmem:[#allocation2 + $0x80] sm:$0xff] %vm346_vm2, %v702_v15 }
  0xa8   : > { %v790_v22 = vadd.f32 %v1357_v11, %v754_v21  ;;  %v762_v23 = vld [vmem:[#allocation2 + $0x40] sm:$0xff]  ;;  %743 = vst.msk [vmem:[#allocation2 + $0xc0] sm:$0xff] %vm346_vm2, %v710_v16 }
  0xa9   : > { %v798_v25 = vadd.f32 %v1357_v11, %v762_v23  ;;  %720 = vst.msk [vmem:[#allocation2 + $0x8] sm:$0xff] %vm346_vm2, %v687_v20  ;;  %v503_v19 = vld [vmem:[#allocation2 + $0xa0] sm:$0xff] }
  0xaa   : > { %822 = vst.msk [vmem:[%s1364_s28] sm:$0xff] %vm346_vm2, %v790_v22  ;;  %v511_v20 = vld [vmem:[#allocation2 + $0xe0] sm:$0xff] }
  0xab   : > { %830 = vst.msk [vmem:[%s1364_s28 + $0x40] sm:$0xff] %vm346_vm2, %v798_v25 }
  0xac   : > { %728 = vst.msk [vmem:[#allocation2 + $0x48] sm:$0xff] %vm346_vm2, %v695_v24  ;;  %v648_v28 = vpop.f32.mrf.mxu2  ;;  %v668_v29 = vpop.f32.mrf.mxu3 }
  0xad   : > { %v703_v30 = vadd.f32 %v648_v28, %v500_v26  ;;  %v711_v31 = vadd.f32 %v668_v29, %v508_v27  ;;  %v611_v33 = vpop.f32.mrf.mxu0  ;;  %v631_v34 = vpop.f32.mrf.mxu1  ;;  %v488_v27 = vld [vmem:[#allocation2 + $0x28] sm:$0xff] }
  0xae   : > { %v770_v35 = vld [vmem:[#allocation2 + $0x80] sm:$0xff]  ;;  %v688_v41 = vadd.f32 %v611_v33, %v485_v32  ;;  %v696_v43 = vadd.f32 %v631_v34, %v493_v36 }
  0xaf   : > { %v806_v37 = vadd.f32 %v1357_v11, %v770_v35  ;;  %v778_v38 = vld [vmem:[#allocation2 + $0xc0] sm:$0xff]  ;;  %736 = vst.msk [vmem:[#allocation2 + $0x88] sm:$0xff] %vm346_vm2, %v703_v30 }
  0xb0   : > { %v814_v39 = vadd.f32 %v1357_v11, %v778_v38  ;;  %v755_v40 = vld [vmem:[#allocation2 + $0x8] sm:$0xff]  ;;  %744 = vst.msk [vmem:[#allocation2 + $0xc8] sm:$0xff] %vm346_vm2, %v711_v31 }
  0xb1   : > { %838 = vst.msk [vmem:[%s1364_s28 + $0x80] sm:$0xff] %vm346_vm2, %v806_v37  ;;  %v791_v42 = vadd.f32 %v1357_v11, %v755_v40  ;;  %v496_v31 = vld [vmem:[#allocation2 + $0x68] sm:$0xff] }
  0xb2   : > { %846 = vst.msk [vmem:[%s1364_s28 + $0xc0] sm:$0xff] %vm346_vm2, %v814_v39  ;;  %v504_v38 = vld [vmem:[#allocation2 + $0xa8] sm:$0xff] }
  0xb3   : > { %823 = vst.msk [vmem:[%s1364_s28 + $0x8] sm:$0xff] %vm346_vm2, %v791_v42  ;;  %v763_v46 = vld [vmem:[#allocation2 + $0x48] sm:$0xff] }
  0xb4   : > { %v799_v47 = vadd.f32 %v1357_v11, %v763_v46  ;;  %721 = vst.msk [vmem:[#allocation2 + $0x10] sm:$0xff] %vm346_vm2, %v688_v41  ;;  %v651_v48 = vpop.f32.mrf.mxu2  ;;  %v671_v49 = vpop.f32.mrf.mxu3  ;;  %v512_v39 = vld [vmem:[#allocation2 + $0xe8] sm:$0xff] }
  0xb5   : > { %729 = vst.msk [vmem:[#allocation2 + $0x50] sm:$0xff] %vm346_vm2, %v696_v43  ;;  %v704_v51 = vadd.f32 %v651_v48, %v501_v44  ;;  %v712_v52 = vadd.f32 %v671_v49, %v509_v45  ;;  %v613_v53 = vpop.f32.mrf.mxu0  ;;  %v633_v55 = vpop.f32.mrf.mxu1 }
  0xb6   : > { %831 = vst.msk [vmem:[%s1364_s28 + $0x48] sm:$0xff] %vm346_vm2, %v799_v47  ;;  %v771_v56 = vld [vmem:[#allocation2 + $0x88] sm:$0xff]  ;;  %v689_v10 = vadd.f32 %v613_v53, %v486_v50  ;;  %v697_v60 = vadd.f32 %v633_v55, %v494_v54  ;;  %v489_v47 = vld [vmem:[#allocation2 + $0x30] sm:$0xff] }
  0xb7   : > { %v807_v57 = vadd.f32 %v1357_v11, %v771_v56  ;;  %v779_v58 = vld [vmem:[#allocation2 + $0xc8] sm:$0xff]  ;;  %737 = vst.msk [vmem:[#allocation2 + $0x90] sm:$0xff] %vm346_vm2, %v704_v51  ;;  %v497_v56 = vld [vmem:[#allocation2 + $0x70] sm:$0xff] }
  0xb8   : > { %v815_v59 = vadd.f32 %v1357_v11, %v779_v58  ;;  %745 = vst.msk [vmem:[#allocation2 + $0xd0] sm:$0xff] %vm346_vm2, %v712_v52 }
  0xb9   : > { %839 = vst.msk [vmem:[%s1364_s28 + $0x88] sm:$0xff] %vm346_vm2, %v807_v57 }
  0xba   : > { %847 = vst.msk [vmem:[%s1364_s28 + $0xc8] sm:$0xff] %vm346_vm2, %v815_v59 }
  0xbb   : > { %v756_v62 = vld [vmem:[#allocation2 + $0x10] sm:$0xff]  ;;  %722 = vst.msk [vmem:[#allocation2 + $0x18] sm:$0xff] %vm346_vm2, %v689_v10 }
  0xbc   : > { %v792_v63 = vadd.f32 %v1357_v11, %v756_v62  ;;  %v764_v0 = vld [vmem:[#allocation2 + $0x50] sm:$0xff]  ;;  %730 = vst.msk [vmem:[#allocation2 + $0x58] sm:$0xff] %vm346_vm2, %v697_v60  ;;  %v653_v1 = vpop.f32.mrf.mxu2  ;;  %v673_v2 = vpop.f32.mrf.mxu3 }
  0xbd   : > { %v800_v3 = vadd.f32 %v1357_v11, %v764_v0  ;;  %v705_v4 = vadd.f32 %v653_v1, %v502_v61  ;;  %v616_v6 = vpop.f32.mrf.mxu0  ;;  %v636_v7 = vpop.f32.mrf.mxu1  ;;  %v713_v14 = vadd.f32 %v673_v2, %v510_v13  ;;  %v505_v10 = vld [vmem:[#allocation2 + $0xb0] sm:$0xff]  ;;  %v490_v2 = vld [vmem:[#allocation2 + $0x38] sm:$0xff] }
  0xbe   : > { %824 = vst.msk [vmem:[%s1364_s28 + $0x10] sm:$0xff] %vm346_vm2, %v792_v63  ;;  %v772_v8 = vld [vmem:[#allocation2 + $0x90] sm:$0xff]  ;;  %v690_v16 = vadd.f32 %v616_v6, %v487_v5  ;;  %v698_v23 = vadd.f32 %v636_v7, %v495_v17  ;;  %v498_v5 = vld [vmem:[#allocation2 + $0x78] sm:$0xff] }
  0xbf   : > { %832 = vst.msk [vmem:[%s1364_s28 + $0x50] sm:$0xff] %vm346_vm2, %v800_v3  ;;  %v808_v9 = vadd.f32 %v1357_v11, %v772_v8  ;;  %v780_v12 = vld [vmem:[#allocation2 + $0xd0] sm:$0xff]  ;;  %v514_v17 = vld [vmem:[#allocation2 + $0xf8] sm:$0xff] }
  0xc0   : > { %v816_v15 = vadd.f32 %v1357_v11, %v780_v12  ;;  %738 = vst.msk [vmem:[#allocation2 + $0x98] sm:$0xff] %vm346_vm2, %v705_v4  ;;  %v513_v0 = vld [vmem:[#allocation2 + $0xf0] sm:$0xff] }
  0xc1   : > { %840 = vst.msk [vmem:[%s1364_s28 + $0x90] sm:$0xff] %vm346_vm2, %v808_v9 }
  0xc2   : > { %848 = vst.msk [vmem:[%s1364_s28 + $0xd0] sm:$0xff] %vm346_vm2, %v816_v15  ;;  %v757_v18 = vld [vmem:[#allocation2 + $0x18] sm:$0xff] }
  0xc3   : > { %v793_v21 = vadd.f32 %v1357_v11, %v757_v18  ;;  %v765_v22 = vld [vmem:[#allocation2 + $0x58] sm:$0xff]  ;;  %746 = vst.msk [vmem:[#allocation2 + $0xd8] sm:$0xff] %vm346_vm2, %v713_v14 }
  0xc4   : > { %v801_v24 = vadd.f32 %v1357_v11, %v765_v22  ;;  %723 = vst.msk [vmem:[#allocation2 + $0x20] sm:$0xff] %vm346_vm2, %v690_v16  ;;  %v656_v25 = vpop.f32.mrf.mxu2  ;;  %v676_v26 = vpop.f32.mrf.mxu3  ;;  %v506_v16 = vld [vmem:[#allocation2 + $0xb8] sm:$0xff] }
  0xc5   : > { %825 = vst.msk [vmem:[%s1364_s28 + $0x18] sm:$0xff] %vm346_vm2, %v793_v21  ;;  %v706_v28 = vadd.f32 %v656_v25, %v503_v19  ;;  %v714_v29 = vadd.f32 %v676_v26, %v511_v20  ;;  %v618_v30 = vpop.f32.mrf.mxu0  ;;  %v638_v32 = vpop.f32.mrf.mxu1 }
  0xc6   : > { %833 = vst.msk [vmem:[%s1364_s28 + $0x58] sm:$0xff] %vm346_vm2, %v801_v24  ;;  %v691_v34 = vadd.f32 %v618_v30, %v488_v27  ;;  %v699_v36 = vadd.f32 %v638_v32, %v496_v31 }
  0xc7   : > { %v773_v33 = vld [vmem:[#allocation2 + $0x98] sm:$0xff]  ;;  %731 = vst.msk [vmem:[#allocation2 + $0x60] sm:$0xff] %vm346_vm2, %v698_v23 }
  0xc8   : > { %v809_v35 = vadd.f32 %v1357_v11, %v773_v33  ;;  %739 = vst.msk [vmem:[#allocation2 + $0xa0] sm:$0xff] %vm346_vm2, %v706_v28 }
  0xc9   : > { %747 = vst.msk [vmem:[#allocation2 + $0xe0] sm:$0xff] %vm346_vm2, %v714_v29 }
  0xca   : > { %841 = vst.msk [vmem:[%s1364_s28 + $0x98] sm:$0xff] %vm346_vm2, %v809_v35  ;;  %v781_v37 = vld [vmem:[#allocation2 + $0xd8] sm:$0xff] }
  0xcb   : > { %v817_v40 = vadd.f32 %v1357_v11, %v781_v37  ;;  %v758_v41 = vld [vmem:[#allocation2 + $0x20] sm:$0xff]  ;;  %724 = vst.msk [vmem:[#allocation2 + $0x28] sm:$0xff] %vm346_vm2, %v691_v34 }
  0xcc   : > { %v794_v42 = vadd.f32 %v1357_v11, %v758_v41  ;;  %732 = vst.msk [vmem:[#allocation2 + $0x68] sm:$0xff] %vm346_vm2, %v699_v36  ;;  %v658_v43 = vpop.f32.mrf.mxu2  ;;  %v678_v44 = vpop.f32.mrf.mxu3 }
  0xcd   : > { %849 = vst.msk [vmem:[%s1364_s28 + $0xd8] sm:$0xff] %vm346_vm2, %v817_v40  ;;  %v707_v45 = vadd.f32 %v658_v43, %v504_v38  ;;  %v715_v46 = vadd.f32 %v678_v44, %v512_v39  ;;  %v621_v48 = vpop.f32.mrf.mxu0  ;;  %v641_v49 = vpop.f32.mrf.mxu1 }
  0xce   : > { %826 = vst.msk [vmem:[%s1364_s28 + $0x20] sm:$0xff] %vm346_vm2, %v794_v42  ;;  %v766_v50 = vld [vmem:[#allocation2 + $0x60] sm:$0xff]  ;;  %v692_v55 = vadd.f32 %v621_v48, %v489_v47  ;;  %v700_v61 = vadd.f32 %v641_v49, %v497_v56 }
  0xcf   : > { %v802_v51 = vadd.f32 %v1357_v11, %v766_v50  ;;  %v774_v52 = vld [vmem:[#allocation2 + $0xa0] sm:$0xff]  ;;  %740 = vst.msk [vmem:[#allocation2 + $0xa8] sm:$0xff] %vm346_vm2, %v707_v45 }
  0xd0   : > { %v810_v53 = vadd.f32 %v1357_v11, %v774_v52  ;;  %v782_v54 = vld [vmem:[#allocation2 + $0xe0] sm:$0xff]  ;;  %748 = vst.msk [vmem:[#allocation2 + $0xe8] sm:$0xff] %vm346_vm2, %v715_v46 }
  0xd1   : > { %834 = vst.msk [vmem:[%s1364_s28 + $0x60] sm:$0xff] %vm346_vm2, %v802_v51  ;;  %v818_v57 = vadd.f32 %v1357_v11, %v782_v54 }
  0xd2   : > { %842 = vst.msk [vmem:[%s1364_s28 + $0xa0] sm:$0xff] %vm346_vm2, %v810_v53  ;;  %v759_v58 = vld [vmem:[#allocation2 + $0x28] sm:$0xff] }
  0xd3   : > { %850 = vst.msk [vmem:[%s1364_s28 + $0xe0] sm:$0xff] %vm346_vm2, %v818_v57  ;;  %v795_v59 = vadd.f32 %v1357_v11, %v759_v58  ;;  %v767_v60 = vld [vmem:[#allocation2 + $0x68] sm:$0xff] }
  0xd4   : > { %v803_v62 = vadd.f32 %v1357_v11, %v767_v60  ;;  %725 = vst.msk [vmem:[#allocation2 + $0x30] sm:$0xff] %vm346_vm2, %v692_v55  ;;  %v661_v63 = vpop.f32.mrf.mxu2  ;;  %v681_v1 = vpop.f32.mrf.mxu3 }
  0xd5   : > { %827 = vst.msk [vmem:[%s1364_s28 + $0x28] sm:$0xff] %vm346_vm2, %v795_v59  ;;  %v708_v13 = vadd.f32 %v661_v63, %v505_v10  ;;  %v623_v3 = vpop.f32.mrf.mxu0  ;;  %v643_v6 = vpop.f32.mrf.mxu1  ;;  %v716_v9 = vadd.f32 %v681_v1, %v513_v0 }
  0xd6   : > { %835 = vst.msk [vmem:[%s1364_s28 + $0x68] sm:$0xff] %vm346_vm2, %v803_v62  ;;  %v775_v4 = vld [vmem:[#allocation2 + $0xa8] sm:$0xff]  ;;  %v693_v14 = vadd.f32 %v623_v3, %v490_v2  ;;  %v701_v15 = vadd.f32 %v643_v6, %v498_v5 }
  0xd7   : > { %v811_v7 = vadd.f32 %v1357_v11, %v775_v4  ;;  %v783_v8 = vld [vmem:[#allocation2 + $0xe8] sm:$0xff]  ;;  %733 = vst.msk [vmem:[#allocation2 + $0x70] sm:$0xff] %vm346_vm2, %v700_v61 }
  0xd8   : > { %v819_v12 = vadd.f32 %v1357_v11, %v783_v8  ;;  %741 = vst.msk [vmem:[#allocation2 + $0xb0] sm:$0xff] %vm346_vm2, %v708_v13 }
  0xd9   : > { %843 = vst.msk [vmem:[%s1364_s28 + $0xa8] sm:$0xff] %vm346_vm2, %v811_v7 }
  0xda   : > { %851 = vst.msk [vmem:[%s1364_s28 + $0xe8] sm:$0xff] %vm346_vm2, %v819_v12 }
  0xdb   : > { %v760_v18 = vld [vmem:[#allocation2 + $0x30] sm:$0xff]  ;;  %749 = vst.msk [vmem:[#allocation2 + $0xf0] sm:$0xff] %vm346_vm2, %v716_v9 }
  0xdc   : > { %v796_v19 = vadd.f32 %v1357_v11, %v760_v18  ;;  %726 = vst.msk [vmem:[#allocation2 + $0x38] sm:$0xff] %vm346_vm2, %v693_v14  ;;  %v663_v20 = vpop.f32.mrf.mxu2  ;;  %v683_v21 = vpop.f32.mrf.mxu3 }
  0xdd   : > { %734 = vst.msk [vmem:[#allocation2 + $0x78] sm:$0xff] %vm346_vm2, %v701_v15  ;;  %v709_v22 = vadd.f32 %v663_v20, %v506_v16  ;;  %v717_v23 = vadd.f32 %v683_v21, %v514_v17 }
  0xde   : > { %828 = vst.msk [vmem:[%s1364_s28 + $0x30] sm:$0xff] %vm346_vm2, %v796_v19  ;;  %v768_v24 = vld [vmem:[#allocation2 + $0x70] sm:$0xff] }
  0xdf   : > { %v804_v25 = vadd.f32 %v1357_v11, %v768_v24  ;;  %v776_v26 = vld [vmem:[#allocation2 + $0xb0] sm:$0xff]  ;;  %742 = vst.msk [vmem:[#allocation2 + $0xb8] sm:$0xff] %vm346_vm2, %v709_v22 }
  0xe0   : > { %v812_v27 = vadd.f32 %v1357_v11, %v776_v26  ;;  %750 = vst.msk [vmem:[#allocation2 + $0xf8] sm:$0xff] %vm346_vm2, %v717_v23 }
  0xe1   : > { %836 = vst.msk [vmem:[%s1364_s28 + $0x70] sm:$0xff] %vm346_vm2, %v804_v25 }
  0xe2   : > { %844 = vst.msk [vmem:[%s1364_s28 + $0xb0] sm:$0xff] %vm346_vm2, %v812_v27  ;;  %v784_v28 = vld [vmem:[#allocation2 + $0xf0] sm:$0xff] }
  0xe3   : > { %v820_v29 = vadd.f32 %v1357_v11, %v784_v28  ;;  %v761_v30 = vld [vmem:[#allocation2 + $0x38] sm:$0xff] }
  0xe4   : > { %v797_v31 = vadd.f32 %v1357_v11, %v761_v30  ;;  %v769_v32 = vld [vmem:[#allocation2 + $0x78] sm:$0xff] }
  0xe5   : > { %852 = vst.msk [vmem:[%s1364_s28 + $0xf0] sm:$0xff] %vm346_vm2, %v820_v29  ;;  %v805_v33 = vadd.f32 %v1357_v11, %v769_v32 }
  0xe6   : > { %829 = vst.msk [vmem:[%s1364_s28 + $0x38] sm:$0xff] %vm346_vm2, %v797_v31  ;;  %v777_v34 = vld [vmem:[#allocation2 + $0xb8] sm:$0xff] }
  0xe7   : > { %837 = vst.msk [vmem:[%s1364_s28 + $0x78] sm:$0xff] %vm346_vm2, %v805_v33  ;;  %v813_v35 = vadd.f32 %v1357_v11, %v777_v34  ;;  %v785_v36 = vld [vmem:[#allocation2 + $0xf8] sm:$0xff] }
  0xe8   : > { %v821_v37 = vadd.f32 %v1357_v11, %v785_v36 }
  0xe9   : > { %845 = vst.msk [vmem:[%s1364_s28 + $0xb8] sm:$0xff] %vm346_vm2, %v813_v35 }
  0xea   : > { %853 = vst.msk [vmem:[%s1364_s28 + $0xf8] sm:$0xff] %vm346_vm2, %v821_v37 }
  0xeb PF: > { %s15_s20 = sadd.s32 1, %s1083_s20   ;;  %s1507_s18 = smov %s1079_s19 }
  0xec   : > { %p12_p5 = scmp.ge.s32.totalorder %s15_s20, 4   ;;  %s1508_s19 = smov %s1510_s21 }
  0xee   :  { %14 = sbr.rel (!%p12_p5) target bundleno = 2 (0x2), region = 90 }

</bundles_post_ra>
